<compile_context>
chip_gen: v7x
topology: tpu7x:2x2x1
jax: 0.10.0
libtpu: 0.0.40
codegen_flags: <defaults>
</compile_context>

<pallas_src>
import functools

import jax
import jax.numpy as jnp
from jax import lax
from jax.experimental import pallas as pl
from jax.experimental.pallas import tpu as pltpu

LANE = 128
TQ_MAX = 256  # q-tile size once S exceeds this


def _round_up(x, m):
    return (x + m - 1) // m * m


def _softmax_attend(q_scaled, k, v, out_dtype):
    """q_scaled: (tq, Dp) already * 1/sqrt(D); k, v: (S, Dp). Returns (tq, Dp)."""
    # scores = q @ k^T: contract on D directly, no materialized transpose.
    s = lax.dot_general(q_scaled, k, (((1,), (1,)), ((), ())),
                        preferred_element_type=jnp.float32)      # (tq, S)
    # Numerically-stable softmax; reciprocal goes to the (otherwise idle) EUP.
    s = s - jnp.max(s, axis=-1, keepdims=True)
    e = jnp.exp(s)
    p = e * pl.reciprocal(jnp.sum(e, axis=-1, keepdims=True), approx=True)
    # attn = p @ v ; padded Dp columns of v are zero -> padded output cols are zero.
    return jnp.dot(p, v, preferred_element_type=jnp.float32).astype(out_dtype)


def _attn_fused_kernel(inv_scale, d_pad, x_ref, w_ref, b_ref, o_ref):
    """Whole sequence in one step: fused Q|K|V projection (one MXU weight push)."""
    x = x_ref[0]                                                  # (S, H)
    qkv = jnp.dot(x, w_ref[...], preferred_element_type=jnp.float32) + b_ref[0]
    q = qkv[:, :d_pad] * inv_scale                                # lane-aligned slices
    k = qkv[:, d_pad:2 * d_pad]
    v = qkv[:, 2 * d_pad:]
    o_ref[0] = _softmax_attend(q, k, v, o_ref.dtype)


def _attn_tiled_kernel(inv_scale, d_pad, x_q_ref, x_kv_ref, wq_ref, bq_ref,
                       wkv_ref, bkv_ref, o_ref, kv_ref):
    """q-tiled path: K/V computed once per batch element (qi == 0) into VMEM scratch."""
    qi = pl.program_id(1)

    @pl.when(qi == 0)
    def _():
        xkv = x_kv_ref[0]                                         # (S, H) full sequence
        kv_ref[...] = (jnp.dot(xkv, wkv_ref[...],
                               preferred_element_type=jnp.float32) + bkv_ref[0])

    xq = x_q_ref[0]                                               # (tq, H) q tile
    q = (jnp.dot(xq, wq_ref[...], preferred_element_type=jnp.float32)
         + bq_ref[0]) * inv_scale                                 # (tq, Dp)
    k = kv_ref[:, :d_pad]                                         # (S, Dp)
    v = kv_ref[:, d_pad:]                                         # (S, Dp)
    o_ref[0] = _softmax_attend(q, k, v, o_ref.dtype)


def attn_forward(x, wk, bk, wq, bq, wv, bv, kqv_dim):
    """x: (B, S, H); wk/wq/wv: (H, D); bk/bq/bv: (1, D). Returns (B, S, D) f32."""
    B, S, H = x.shape
    D = kqv_dim
    d_pad = _round_up(D, LANE)            # lane-dense matmul N-dim & output stores
    inv_scale = 1.0 / (float(D) ** 0.5)

    # Zero-pad projections to d_pad lanes: padded K/Q columns contribute 0 to q.k^T,
    # padded V columns yield 0s that the wrapper slices off.
    pad_w = lambda w: jnp.pad(w, ((0, 0), (0, d_pad - D)))
    pad_b = lambda b: jnp.pad(b, ((0, 0), (0, d_pad - D)))

    cparams = pltpu.CompilerParams(
        dimension_semantics=("parallel",) if S <= TQ_MAX else ("parallel", "arbitrary"),
        vmem_limit_bytes=32 * 1024 * 1024,  # well under every chip's physical VMEM
    )

    if S <= TQ_MAX:
        # Single grid step per batch element: fuse all three projections.
        w_qkv = jnp.concatenate([pad_w(wq), pad_w(wk), pad_w(wv)], axis=1)  # (H, 3*Dp)
        b_qkv = jnp.concatenate([pad_b(bq), pad_b(bk), pad_b(bv)], axis=1)  # (1, 3*Dp)
        out_padded = pl.pallas_call(
            functools.partial(_attn_fused_kernel, inv_scale, d_pad),
            out_shape=jax.ShapeDtypeStruct((B, S, d_pad), jnp.float32),
            grid_spec=pltpu.PrefetchScalarGridSpec(
                num_scalar_prefetch=0,
                grid=(B,),
                in_specs=[
                    pl.BlockSpec((1, S, H), lambda b: (b, 0, 0)),          # x
                    pl.BlockSpec((H, 3 * d_pad), lambda b: (0, 0)),        # w_q|k|v
                    pl.BlockSpec((1, 3 * d_pad), lambda b: (0, 0)),        # b_q|k|v
                ],
                out_specs=pl.BlockSpec((1, S, d_pad), lambda b: (b, 0, 0)),
            ),
            compiler_params=cparams,
        )(x, w_qkv, b_qkv)
    else:
        # TODO(synk): for very large S, add a kv grid axis with online softmax
        # (flash-attention structure) so live VMEM stays O(tq*tk) instead of O(S*Dp).
        tq = TQ_MAX
        assert S % tq == 0, "sequence length must be a multiple of the q tile"
        n_q = S // tq

        wq_p, bq_p = pad_w(wq), pad_b(bq)
        wkv_p = jnp.concatenate([pad_w(wk), pad_w(wv)], axis=1)            # (H, 2*Dp)
        bkv_p = jnp.concatenate([pad_b(bk), pad_b(bv)], axis=1)            # (1, 2*Dp)

        out_padded = pl.pallas_call(
            functools.partial(_attn_tiled_kernel, inv_scale, d_pad),
            out_shape=jax.ShapeDtypeStruct((B, S, d_pad), jnp.float32),
            grid_spec=pltpu.PrefetchScalarGridSpec(
                num_scalar_prefetch=0,
                grid=(B, n_q),
                in_specs=[
                    pl.BlockSpec((1, tq, H), lambda b, qi: (b, qi, 0)),    # x (q tile)
                    pl.BlockSpec((1, S, H), lambda b, qi: (b, 0, 0)),      # x (kv, full S)
                    pl.BlockSpec((H, d_pad), lambda b, qi: (0, 0)),        # wq (padded)
                    pl.BlockSpec((1, d_pad), lambda b, qi: (0, 0)),        # bq (padded)
                    pl.BlockSpec((H, 2 * d_pad), lambda b, qi: (0, 0)),    # w_k|v fused
                    pl.BlockSpec((1, 2 * d_pad), lambda b, qi: (0, 0)),    # b_k|v fused
                ],
                out_specs=pl.BlockSpec((1, tq, d_pad), lambda b, qi: (b, qi, 0)),
                scratch_shapes=[pltpu.VMEM((S, 2 * d_pad), jnp.float32)],  # cached K|V
            ),
            compiler_params=cparams,
        )(x, x, wq_p, bq_p, wkv_p, bkv_p)

    return out_padded[..., :D]


def attn_reference(x, wk, bk, wq, bq, wv, bv, kqv_dim):
    k = x @ wk + bk[0]
    q = x @ wq + bq[0]
    v = x @ wv + bv[0]
    s = jnp.einsum("bqd,bkd->bqk", q, k) / (float(kqv_dim) ** 0.5)
    w = jax.nn.softmax(s, axis=-1)
    return jnp.einsum("bqk,bkd->bqd", w, v)


def _run_case(B, S, H, D, seed=0):
    key = jax.random.PRNGKey(seed)
    kx, kwk, kbk, kwq, kbq, kwv, kbv = jax.random.split(key, 7)

    x = jax.random.normal(kx, (B, S, H), dtype=jnp.float32)
    # Deterministic parameter init (mimics nn.Linear uniform init range 1/sqrt(H))
    lim = 1.0 / (H ** 0.5)
    wk = jax.random.uniform(kwk, (H, D), jnp.float32, -lim, lim)
    bk = jax.random.uniform(kbk, (1, D), jnp.float32, -lim, lim)
    wq = jax.random.uniform(kwq, (H, D), jnp.float32, -lim, lim)
    bq = jax.random.uniform(kbq, (1, D), jnp.float32, -lim, lim)
    wv = jax.random.uniform(kwv, (H, D), jnp.float32, -lim, lim)
    bv = jax.random.uniform(kbv, (1, D), jnp.float32, -lim, lim)

    out = attn_forward(x, wk, bk, wq, bq, wv, bv, D)
    out = jax.block_until_ready(out)

    ref = attn_reference(x, wk, bk, wq, bq, wv, bv, D)
    assert out.shape == (B, S, D)
    # approx=True reciprocal (EUP vrcp) is accurate to ~1e-4 relative; allow 1e-3.
    assert jnp.allclose(out, ref, atol=1e-3, rtol=1e-3), \
        f"mismatch vs reference at shape B={B} S={S} H={H} D={D}"


if __name__ == "__main__":
    # Primary small-shape case (batch=2, seq=8, hidden=32, kqv=16) -> fused-QKV path.
    _run_case(2, 8, 32, 16)
    # Also exercise the q-tiled path with cached K/V (S > TQ_MAX).
    _run_case(2, 512, 32, 16)
    print("KERNEL_OK")
</pallas_src>

<mosaic_0001>
module attributes {stable_mosaic.version = 11 : i64} {
  func.func @_attn_fused_kernel(%arg0: i32, %arg1: memref<1x8x32xf32, #tpu.memory_space<vmem>>, %arg2: memref<32x384xf32, #tpu.memory_space<vmem>>, %arg3: memref<1x384xf32, #tpu.memory_space<vmem>>, %arg4: memref<1x8x128xf32, #tpu.memory_space<vmem>>) attributes {dimension_semantics = [#tpu.dimension_semantics<parallel>], iteration_bounds = array<i64: 2>, scalar_prefetch = 0 : i64, scratch_operands = 0 : i64, tpu.core_type = #tpu.core_type<tc>, window_params = [{transform_indices = @transform_0, window_bounds = array<i64: 1, 8, 32>}, {pipeline_mode = #tpu.pipeline_mode<synchronous>, transform_indices = @transform_1, window_bounds = array<i64: 32, 384>}, {pipeline_mode = #tpu.pipeline_mode<synchronous>, transform_indices = @transform_2, window_bounds = array<i64: 1, 384>}, {transform_indices = @transform_3, window_bounds = array<i64: 1, 8, 128>}]} {
    %c0 = arith.constant 0 : index
    %c0_0 = arith.constant 0 : index
    %c0_1 = arith.constant 0 : index
    %0 = vector.load %arg1[%c0, %c0_0, %c0_1] : memref<1x8x32xf32, #tpu.memory_space<vmem>>, vector<1x8x32xf32>
    %1 = vector.shape_cast %0 : vector<1x8x32xf32> to vector<8x32xf32>
    %c0_2 = arith.constant 0 : index
    %c0_3 = arith.constant 0 : index
    %2 = vector.load %arg2[%c0_2, %c0_3] : memref<32x384xf32, #tpu.memory_space<vmem>>, vector<32x384xf32>
    %cst = arith.constant dense<0.000000e+00> : vector<8x384xf32>
    %3 = tpu.matmul %1, %2, %cst {dimension_numbers = #tpu.dot_dimension_numbers<[1], [0], [0], [1], [0, 0, 1, 1], [], []>} : vector<8x32xf32>, vector<32x384xf32>, vector<8x384xf32> -> vector<8x384xf32>
    %c0_4 = arith.constant 0 : index
    %c0_5 = arith.constant 0 : index
    %4 = vector.load %arg3[%c0_4, %c0_5] : memref<1x384xf32, #tpu.memory_space<vmem>>, vector<1x384xf32>
    %5 = vector.shape_cast %4 : vector<1x384xf32> to vector<384xf32>
    %6 = vector.shape_cast %5 : vector<384xf32> to vector<1x384xf32>
    %7 = vector.broadcast %6 : vector<1x384xf32> to vector<8x384xf32>
    %8 = arith.addf %3, %7 : vector<8x384xf32>
    %9 = vector.extract_strided_slice %8 {offsets = [0, 0], sizes = [8, 128], strides = [1, 1]} : vector<8x384xf32> to vector<8x128xf32>
    %cst_6 = arith.constant 2.500000e-01 : f32
    %10 = vector.broadcast %cst_6 : f32 to vector<8x128xf32>
    %11 = arith.mulf %9, %10 : vector<8x128xf32>
    %12 = vector.extract_strided_slice %8 {offsets = [0, 128], sizes = [8, 128], strides = [1, 1]} : vector<8x384xf32> to vector<8x128xf32>
    %13 = vector.extract_strided_slice %8 {offsets = [0, 256], sizes = [8, 128], strides = [1, 1]} : vector<8x384xf32> to vector<8x128xf32>
    %cst_7 = arith.constant dense<0.000000e+00> : vector<8x8xf32>
    %14 = tpu.matmul %11, %12, %cst_7 {dimension_numbers = #tpu.dot_dimension_numbers<[1], [1], [0], [0], [0, 0, 1, 0], [], []>} : vector<8x128xf32>, vector<8x128xf32>, vector<8x8xf32> -> vector<8x8xf32>
    %cst_8 = arith.constant dense<0xFF800000> : vector<8xf32>
    %15 = vector.multi_reduction <maximumf>, %14, %cst_8 [1] : vector<8x8xf32> to vector<8xf32>
    %16 = vector.shape_cast %15 : vector<8xf32> to vector<8x1xf32>
    %17 = vector.broadcast %16 : vector<8x1xf32> to vector<8x8xf32>
    %18 = arith.subf %14, %17 : vector<8x8xf32>
    %19 = math.exp %18 : vector<8x8xf32>
    %cst_9 = arith.constant dense<0.000000e+00> : vector<8xf32>
    %20 = vector.multi_reduction <add>, %19, %cst_9 [1] : vector<8x8xf32> to vector<8xf32>
    %21 = vector.shape_cast %20 : vector<8xf32> to vector<8x1xf32>
    %22 = tpu.reciprocal %21 {approx = true} : vector<8x1xf32> -> vector<8x1xf32>
    %23 = vector.broadcast %22 : vector<8x1xf32> to vector<8x8xf32>
    %24 = arith.mulf %19, %23 : vector<8x8xf32>
    %cst_10 = arith.constant dense<0.000000e+00> : vector<8x128xf32>
    %25 = tpu.matmul %24, %13, %cst_10 {dimension_numbers = #tpu.dot_dimension_numbers<[1], [0], [0], [1], [0, 0, 1, 1], [], []>} : vector<8x8xf32>, vector<8x128xf32>, vector<8x128xf32> -> vector<8x128xf32>
    %c0_11 = arith.constant 0 : index
    %c0_12 = arith.constant 0 : index
    %c0_13 = arith.constant 0 : index
    %26 = vector.load %arg4[%c0_11, %c0_12, %c0_13] : memref<1x8x128xf32, #tpu.memory_space<vmem>>, vector<1x8x128xf32>
    %27 = vector.shape_cast %26 : vector<1x8x128xf32> to vector<8x128xf32>
    %28 = vector.shape_cast %25 : vector<8x128xf32> to vector<1x8x128xf32>
    tpu.vector_store %arg4[%c0_11, %c0_12, %c0_13], %28 {strides = array<i32>} : memref<1x8x128xf32, #tpu.memory_space<vmem>>, vector<1x8x128xf32>,
    return
  }
  func.func @transform_0(%arg0: i32) -> (i32, i32, i32) {
    %c0_i32 = arith.constant 0 : i32
    %c0_i32_0 = arith.constant 0 : i32
    %c0_i32_1 = arith.constant 0 : i32
    return %arg0, %c0_i32, %c0_i32_0 : i32, i32, i32
  }
  func.func @transform_1(%arg0: i32) -> (i32, i32) {
    %c0_i32 = arith.constant 0 : i32
    %c0_i32_0 = arith.constant 0 : i32
    %c0_i32_1 = arith.constant 0 : i32
    return %c0_i32, %c0_i32_0 : i32, i32
  }
  func.func @transform_2(%arg0: i32) -> (i32, i32) {
    %c0_i32 = arith.constant 0 : i32
    %c0_i32_0 = arith.constant 0 : i32
    %c0_i32_1 = arith.constant 0 : i32
    return %c0_i32, %c0_i32_0 : i32, i32
  }
  func.func @transform_3(%arg0: i32) -> (i32, i32, i32) {
    %c0_i32 = arith.constant 0 : i32
    %c0_i32_0 = arith.constant 0 : i32
    %c0_i32_1 = arith.constant 0 : i32
    return %arg0, %c0_i32, %c0_i32_0 : i32, i32, i32
  }
}

</mosaic_0001>

<bundles_post_ra>
// kernel: tpu_custom_call.1
= control target key start
LH: loop header
LB: loop body
LE: loop exit
PB: predicated region body
PF: predicated region fallthrough
CT: control target
= control target key end

     0   :  { %8 = vsyncpa [#allocation3], 0  ;;  %s1123_s0 = inlined_call_operand.hbm [shape: f32[2,8,32], index: 0, kind: input, shape index: {}]   ;;  %s1124_s1 = inlined_call_operand.hbm [shape: f32[32,384], index: 1, kind: input, shape index: {}]   ;;  %s1125_s2 = inlined_call_operand.vmem [shape: f32[1,384], index: 2, kind: input, shape index: {}]   ;;  %s1126_s3 = inlined_call_operand.hbm [shape: f32[2,8,128], index: 3, kind: output, shape index: {}]  }
   0x1   :  { %10 = vsyncpa [#allocation3 + $0x1], 0 }
   0x2   :  { %11 = vsyncpa [#allocation6], 0 }
   0x3   :  { %12 = vsyncpa [#allocation4], 0 }
   0x4   :  { %14 = vsyncpa [#allocation4 + $0x1], 0  ;;  %s912_s12 = smov 0   ;;  %s914_s13 = smov 0  }
   0x5   :  { %s916_s14 = smov 0   ;;  %s918_s15 = smov 0  }
   0x6 LB: > { %s933_s16 = sadd.s32 4294967295, %s882_s15   ;;  %s627_s17 = sadd.s32 4294967294, %s882_s15   ;;  %s882_s15 = sphi %s918_s15, %s1146_s15   ;;  %s878_s14 = sphi %s916_s14, %s1145_s14   ;;  %s874_s13 = sphi %s914_s13, %s1144_s13   ;;  %s870_s12 = sphi %s912_s12, %s1143_s12  }
   0x7   : > { %p40_p0 = scmp.ne.s32.totalorder %s874_s13, %s870_s12  ;;  %p1127_p1 = scmp.eq.s32.totalorder %s933_s16, 0 }
   0x8   : > { %p112_p3 = scmp.eq.s32.totalorder %s627_s17, 1  ;;  %p628_p5 = scmp.ge.s32.totalorder %s882_s15, 1 }
   0x9   : > { %p942_p4 = por %p1127_p1, %p40_p0  ;;  %p119_p7 = scmp.lt.s32.totalorder %s882_s15, 3 }
   0xa   : > { %p947_p6 = por %p112_p3, %p40_p0  ;;  %s884_s21 = smov [#allocation5]  }
   0xb   : > { %s1130_s18 = scalar_select %p942_p4, 1, 0 }
   0xc   : > { %s1131_s19 = scalar_select %p947_p6, 1, 0 }
   0xd   : > { %p952_p8 = pnand %p628_p5, %p119_p7  ;;  %s131_s22 = sshll.u32 %s884_s21, 4  ;;  %s956_s22 = int_to_ptr.vmem [resolvable:$true] %s131_s22 }
   0xe   : > { %s968_s24 = sadd.s32 1, %s882_s15   ;;  %s27_s25 = sadd.s32 1, %s878_s14 }
   0xf   : > { %s1132_s20 = scalar_select %p952_p8, 1, 0 }
  0x10   : > { %p696_p9 = pneg %p952_p8  ;;  %s24_s26 = ssub.s32 %s882_s15, %s968_s24 }
  0x11   : > { %s754_s29 = scalar_lea.hbm %s1124_s1, 1536 }
  0x12   : > { %p963_p11 = pnand %p696_p9, %p1127_p1  ;;  %p755_p12 = scmp.ne.s32.totalorder %s1124_s1, %s754_s29 }
  0x13   : > { %p761_p5 = scmp.lt.u32.totalorder %s754_s29, %s1124_s1 }
  0x14   : > { %p756_p13 = pneg %p963_p11 }
  0x16   : > { %p757_p0 = pnand %p756_p13, %p755_p12 }
  0x18   : > { %p758_p3 = pneg %p757_p0 }
  0x1a   : > { %p763_p7 = pnand %p761_p5, %p758_p3 }
  0x1c   : > { %766 = shalt.err (!%p763_p7)
}
  0x1d   : > { %s767_s7 = scalar_lea.vmem %s956_s22, 1536  ;;  %p775_p2 = scmp.lt.s32.totalorder %s956_s22, %s956_s22 }
  0x1e   : > { %p768_p9 = scmp.ne.s32.totalorder %s956_s22, %s767_s7  ;;  %p776_p6 = scmp.lt.s32.totalorder %s767_s7, %s767_s7 }
  0x20   : > { %p770_p10 = pnand %p768_p9, %p756_p13  ;;  %p777_p4 = por %p776_p6, %p775_p2 }
  0x22   : > { %p771_p1 = pneg %p770_p10 }
  0x24   : > { %p778_p8 = pnand %p777_p4, %p771_p1 }
  0x26   : > { %781 = shalt.err (!%p778_p8)
}
  0x27   : > { %s885_s8 = smov 384   ;;  %s886_s9 = smov 24  }
  0x28   : > { %699 = dma.hbm_to_vmem [thread:$0]  (!%p963_p11), %s1124_s1, 1536, %s956_s22, [#allocation6], %s885_s8, %s885_s8, %s886_s9  }
  0x29   : > { %p25_p2 = scmp.eq.s32.totalorder %s24_s26, 0  ;;  %p34_p1 = scmp.ne.s32.totalorder %s878_s14, %s874_s13 }
  0x2a   : > { %p35_p4 = scmp.eq.s32.totalorder %s882_s15, 0  ;;  %p709_p6 = scmp.lt.s32.totalorder %s882_s15, 2 }
  0x2b   : > { %s999_s17 = scalar_select %p25_p2, %s878_s14, %s27_s25  }
  0x2c   : > { %p36_p8 = por %p35_p4, %p34_p1  ;;  %p1134_p10 = scmp.eq.s32.totalorder %s933_s16, 1 }
  0x2d   : > { %s148_s27 = sand.u32 1, %s878_s14   ;;  %s632_s28 = sshll.u32 %s882_s15, 7 }
  0x2e   : > { %p1003_p12 = por %p1134_p10, %p34_p1  ;;  %s631_s29 = sshll.u32 %s148_s27, 3 }
  0x2f   : > { %s1012_s4 = scalar_lea.hbm %s1123_s0, %s632_s28  ;;  %s152_s22 = scalar_lea.vmem [#allocation2], %s631_s29 }
  0x30   : > { %s159_s25 = sshll.u32 %s152_s22, 4  ;;  %p1014_p11 = pnand %p709_p6, %p36_p8  ;;  %s1018_s25 = int_to_ptr.vmem [resolvable:$true] %s159_s25 }
  0x31   : > { %s149_s5 = scalar_lea.sflag [#allocation3], %s148_s27  ;;  %s782_s6 = scalar_lea.hbm %s1012_s4, 128 }
  0x32   : > { %p783_p13 = scmp.ne.s32.totalorder %s1012_s4, %s782_s6  ;;  %p784_p0 = pneg %p1014_p11 }
  0x33   : > { %s787_s9 = scalar_lea.hbm %s1123_s0, 256  ;;  %p788_p7 = scmp.lt.u32.totalorder %s1012_s4, %s1123_s0 }
  0x34   : > { %p785_p3 = pnand %p784_p0, %p783_p13  ;;  %p789_p9 = scmp.lt.u32.totalorder %s787_s9, %s782_s6 }
  0x35   : > { %p791_p1 = scmp.lt.u32.totalorder %s782_s6, %s1012_s4 }
  0x36   : > { %p786_p5 = pneg %p785_p3  ;;  %p790_p2 = por %p789_p9, %p788_p7 }
  0x38   : > { %p792_p4 = por %p791_p1, %p790_p2 }
  0x3a   : > { %p793_p6 = pnand %p792_p4, %p786_p5 }
  0x3c   : > { %796 = shalt.err (!%p793_p6)
}
  0x3d   : > { %s797_s27 = scalar_lea.vmem %s1018_s25, 128  ;;  %s887_s28 = smov [#allocation2]  }
  0x3e   : > { %p798_p8 = scmp.ne.s32.totalorder %s1018_s25, %s797_s27  ;;  %s802_s29 = sshll.u32 %s887_s28, 4  ;;  %s803_s29 = int_to_ptr.vmem [resolvable:$false] %s802_s29 }
  0x3f   : > { %s804_s23 = scalar_lea.vmem %s803_s29, 256  ;;  %p805_p3 = scmp.lt.s32.totalorder %s1018_s25, %s803_s29 }
  0x40   : > { %p800_p10 = pnand %p798_p8, %p784_p0  ;;  %p806_p7 = scmp.lt.s32.totalorder %s804_s23, %s797_s27 }
  0x42   : > { %p801_p13 = pneg %p800_p10  ;;  %p807_p9 = por %p806_p7, %p805_p3 }
  0x44   : > { %p808_p2 = pnand %p807_p9, %p801_p13 }
  0x46   : > { %811 = shalt.err (!%p808_p2)
}
  0x47   : > { %703 = dma.hbm_to_vmem [thread:$0]  (!%p1014_p11), %s1012_s4, 128, %s1018_s25, %s149_s5  }
  0x48   : > { %p1137_p5 = scmp.ne.s32.totalorder %s1132_s20, 0 }
  0x49   : > { %s1048_s30 = sand.u32 (!%p1137_p5), 1, %s874_s13   ;;  %p1138_p0 = scmp.ne.s32.totalorder (!%p1137_p5), %s1130_s18, 0 }
  0x4a   : > { %168 = sbr.rel (%p1137_p5) target bundleno = 1066 (0x42a), region = 32  ;;  %s634_s22 = sshll.u32 (!%p1137_p5), %s1048_s30, 3 }
  0x4b   : > { %s171_s6 = scalar_lea.sflag (!%p1137_p5), [#allocation3], %s1048_s30  ;;  %s174_s7 = scalar_lea.vmem (!%p1137_p5), [#allocation2], %s634_s22 }
  0x51   : > { %857 = dma.done.wait (%p1138_p0), %s171_s6, 128  }
  0x52   : > { %859 = vsyncadd (%p1138_p0), %s171_s6, 4294967168  ;;  %p1139_p11 = scmp.eq.s32.totalorder %s933_s16, 0 }
  0x54   : > { %861 = dma.done.wait (%p1139_p11), [#allocation6], 1536   ;;  %p1140_p1 = pmov %p1139_p11 }
  0x55   : > { %v888_v0 = vmov 0.0   ;;  %v203_v1 = vld [vmem:[#allocation5 + $0x8] sm:$0xff]  ;;  %v206_v2 = vld [vmem:[#allocation5 + $0x20] sm:$0xff]  ;;  %v205_v5 = vld [vmem:[#allocation5 + $0x18] sm:$0xff]  ;;  %vm231_vm0 = vcmask 261120   ;;  %vm889_vm1 = vmmov 0   ;;  %v216_v14 = vlaneseq }
  0x56   : > { %863 = vsyncadd (%p1140_p1), [#allocation6], 4294965760  ;;  %299 = vmatprep.mubr.f32.mxu0 %v888_v0  ;;  %v202_v3 = vld [vmem:[#allocation5] sm:$0xff]  ;;  %v674_v4 = vpack.c.bf16 %v206_v2, %v203_v1  ;;  %v209_v6 = vld [vmem:[#allocation5 + $0x38] sm:$0xff]  ;;  %661 = vmatprep.mubr.msk.f32.mxu1 %vm889_vm1, %v888_v0  ;;  %v890_v29 = vmov 0.0|0.0   ;;  %vm447_vm2 = vcmask 64512  }
  0x57   : > { %v212_v7 = vld [vmem:[#allocation5 + $0x50] sm:$0xff]  ;;  %v676_v8 = vpack.c.bf16 %v205_v5, %v202_v3  ;;  %v211_v11 = vld [vmem:[#allocation5 + $0x48] sm:$0xff]  ;;  %v217_v15 = vshrl.u32 %v216_v14, 7  ;;  %v210_v28 = vld [vmem:[#allocation5 + $0x40] sm:$0xff]  ;;  %682 = vmatprep.subr.bf16.mxu1 %v890_v29  ;;  %s200_s4 = scalar_lea.vmem [#allocation7], %s634_s22  ;;  %s641_s26 = sshll.u32 %s933_s16, 7 }
  0x58   : > { %v678_v9 = vpack.c.bf16 %v212_v7, %v209_v6  ;;  %v208_v10 = vld [vmem:[#allocation5 + $0x30] sm:$0xff]  ;;  %675 = vmatprep.subr.bf16.mxu0 %v674_v4  ;;  %v207_v27 = vld [vmem:[#allocation5 + $0x28] sm:$0xff]  ;;  %v213_v31 = vld [vmem:[#allocation5 + $0x58] sm:$0xff]  ;;  %s547_s25 = sshll.u32 %s200_s4, 4  ;;  %s1081_s9 = scalar_lea.hbm %s1126_s3, %s641_s26  ;;  %s1076_s25 = int_to_ptr.vmem [resolvable:$true] %s547_s25 }
  0x59   : > { %677 = vmatpush1.bf16.msra.mxu0 %v676_v8  ;;  %v680_v12 = vpack.c.bf16 %v211_v11, %v208_v10  ;;  %v201_v13 = vld [vmem:[%s174_s7] sm:$0xff]  ;;  %v218_v16 = vsub.s32 0, %v217_v15  ;;  %v222_v18 = vsub.s32 1, %v217_v15  ;;  %v686_v32 = vpack.c.bf16 %v213_v31, %v210_v28  ;;  %s534_s10 = scalar_lea.sflag [#allocation4], %s1048_s30  ;;  %s812_s11 = scalar_lea.vmem %s1076_s25, 128 }
  0x5a   : > { %679 = vmatprep.subr.bf16.mxu0 %v678_v9  ;;  %v214_v17 = vld [vmem:[%s1125_s2] sm:$0x7]  ;;  %v226_v41 = vsub.s32 2, %v217_v15  ;;  %p813_p4 = scmp.ne.s32.totalorder %s1076_s25, %s812_s11  ;;  %s891_s16 = smov [#allocation7]  }
  0x5b   : > { %v219_v19 = vrot.slane %v214_v17, %v218_v16  ;;  %v223_v20 = vrot.slane %v214_v17, %v222_v18  ;;  %v204_v26 = vld [vmem:[#allocation5 + $0x10] sm:$0xff]  ;;  %s816_s27 = sshll.u32 %s891_s16, 4  ;;  %s817_s27 = int_to_ptr.vmem [resolvable:$false] %s816_s27 }
  0x5c   : > { %v683_v30 = vpack.c.bf16 %v207_v27, %v204_v26  ;;  %v227_v42 = vrot.slane %v214_v17, %v226_v41  ;;  %p814_p6 = pnand %p813_p4, %p1003_p12  ;;  %s818_s28 = scalar_lea.vmem %s817_s27, 256 }
  0x5d   : > { %681 = vmatpush1.bf16.msra.mxu0 %v680_v12  ;;  %p819_p10 = scmp.lt.s32.totalorder %s1076_s25, %s817_s27  ;;  %p820_p13 = scmp.lt.s32.totalorder %s818_s28, %s812_s11 }
  0x5e   : > { %664 = vmatprep.subr.mxu0 %v888_v0  ;;  %684 = vmatpush3.bf16.msra.mxu1 %v683_v30  ;;  %p815_p8 = pneg %p814_p6 }
  0x5f   : > { %685 = vmatprep.subr.bf16.mxu1 %v890_v29  ;;  %p821_p3 = por %p820_p13, %p819_p10 }
  0x60   : > { %637 = vmatmul.mubr.msk.f32.vlgmr.msra.gmra.mrb[0].mxu0 %vm231_vm0, %v201_v13 }
  0x61   : > { %666 = vmatprep.mubr.msk.f32.mxu0 %vm889_vm1, %v888_v0  ;;  %p822_p7 = pnand %p821_p3, %p815_p8 }
  0x62   : > { %687 = vmatpush3.bf16.msra.mxu1 %v686_v32 }
  0x63   : > { %669 = vmatprep.subr.mxu1 %v888_v0 }
  0x65   : > { %662 = vmatmul.mubr.msk.f32.vlgmr.msra.gmra.mrb[0].mxu1 %vm231_vm0, %v201_v13 }
  0x66   : > { %671 = vmatprep.mubr.msk.f32.mxu1 %vm889_vm1, %v888_v0 }
 0x133   : > { %v301_v21 = vpop.f32.mrb[0].mxu0 }
 0x134   : > { %v302_v22 = vadd.f32 %v301_v21, %v219_v19  ;;  %v303_v23 = vpop.f32.mrb[1].mxu0 }
 0x135   : > { %v304_v24 = vadd.f32 %v303_v23, %v223_v20 }
 0x136   : > { %v376_v25 = vmul.f32 0.25, %v302_v22 }
 0x137   : > { %665 = vmatpush3.xpose.msra.mxu0 %v304_v24 }
 0x138   : > { %v372_v43 = vpop.f32.mrb[0].mxu1 }
 0x139   : > { %v663_v44 = vpop.f32.mrb[1].mxu1  ;;  %v373_v45 = vadd.f32 %v372_v43, %v227_v42 }
 0x13a   : > { %667 = vmatmul.mubr.f32.vlgmr.msra.gmra.mrb[2].mxu0 %v376_v25 }
 0x13b   : > { %670 = vmatpush3.msra.mxu1 %v373_v45 }
 0x20d   : > { %v443_v33 = vpop.f32.mrb[2].mxu0 }
 0x20e   : > { %v668_v34 = vpop.f32.mrb[3].mxu0  ;;  %v448_v35 = vsel %vm447_vm2, %v443_v33, -inf }
 0x20f   : > { %449 = vmax.xlane.f32.xlu0 %v448_v35 }
 0x29c   : > { %v450_v36 = vpop.xlane.xlu0 %449 }
 0x29d   : > { %v451_v37 = vsub.f32 %v443_v33, %v450_v36 }
 0x29f   : > { %v452_v38 = vmul.f32 1.442695, %v451_v37 }
 0x2a1   : > { %750 = vpow2.f32 %v452_v38 }
 0x2ab   : > { %v751_v39 = vpop.eup %750 }
 0x2ac   : > { %v454_v40 = vsel %vm447_vm2, %v751_v39, 0.0 }
 0x2ad   : > { %455 = vadd.xlane.f32.xlu0 %v454_v40 }
 0x33a   : > { %v456_v46 = vpop.xlane.xlu0 %455 }
 0x33b   : > { %752 = vrcp.f32 %v456_v46 }
 0x345   : > { %v753_v47 = vpop.eup %752 }
 0x346   : > { %v458_v48 = vmul.f32 %v753_v47, %v751_v39 }
 0x348   : > { %672 = vmatmul.mubr.msk.f32.vlgmr.msra.gmra.mrb[2].mxu1 %vm447_vm2, %v458_v48 }
 0x41b   : > { %v528_v49 = vpop.f32.mrb[2].mxu1 }
 0x41c   : > { %532 = vst [vmem:[%s200_s4] sm:$0xff] %v528_v49  ;;  %v673_v50 = vpop.f32.mrb[3].mxu1 }
 0x41d   : > { %825 = shalt.err (!%p822_p7)
}
 0x41e   : > { %s826_s29 = scalar_lea.hbm %s1081_s9, 128  ;;  %s830_s22 = scalar_lea.hbm %s1126_s3, 256 }
 0x41f   : > { %p827_p9 = scmp.ne.s32.totalorder %s1081_s9, %s826_s29  ;;  %p831_p0 = scmp.lt.u32.totalorder %s1081_s9, %s1126_s3 }
 0x420   : > { %p832_p11 = scmp.lt.u32.totalorder %s830_s22, %s826_s29  ;;  %p834_p4 = scmp.lt.u32.totalorder %s826_s29, %s1081_s9 }
 0x421   : > { %p828_p2 = pnand %p827_p9, %p1003_p12 }
 0x422   : > { %p833_p1 = por %p832_p11, %p831_p0 }
 0x423   : > { %p829_p5 = pneg %p828_p2 }
 0x424   : > { %p835_p6 = por %p834_p4, %p833_p1 }
 0x426   : > { %p836_p8 = pnand %p835_p6, %p829_p5 }
 0x428   : > { %839 = shalt.err (!%p836_p8)
}
 0x429   : > { %694 = dma.vmem_to_hbm [thread:$0]  (%p1003_p12), %s1076_s25, 128, %s1081_s9, %s534_s10  }
 0x42a PF: > { %s559_s18 = sand.u32 1, %s870_s12   ;;  %p1141_p10 = scmp.ne.s32.totalorder %s1131_s19, 0 }
 0x42b   : > { %p1142_p13 = scmp.ge.s32.totalorder %s882_s15, 2  ;;  %s560_s20 = scalar_lea.sflag [#allocation4], %s559_s18 }
 0x42d   : > { %p705_p3 = pnand %p1142_p13, %p1141_p10 }
 0x42f   : > { %865 = dma.done.wait (!%p705_p3), %s560_s20, 128  }
 0x430   : > { %867 = vsyncadd (!%p705_p3), %s560_s20, 4294967168  ;;  %p17_p7 = scmp.ge.s32.totalorder %s968_s24, 4   ;;  %s1143_s12 = smov %s874_s13 }
 0x431   : > { %s1144_s13 = smov %s878_s14  ;;  %s1145_s14 = smov %s999_s17 }
 0x432   : > { %s1146_s15 = smov %s968_s24  ;;  %19 = sbr.rel (!%p17_p7) target bundleno = 6 (0x6), region = 81 }
 0x439   :  { %565 = vsyncpa [#allocation3], 1 }
 0x43a   :  { %567 = vsyncpa [#allocation3 + $0x1], 1 }
 0x43b   :  { %568 = vsyncpa [#allocation6], 1 }
 0x43c   :  { %569 = vsyncpa [#allocation4], 1 }
 0x43d   :  { %571 = vsyncpa [#allocation4 + $0x1], 1 }

</bundles_post_ra>
